<compile_context>
chip_gen: v6e
topology: v6e:2x2x1
jax: 0.10.0
libtpu: 0.0.40
codegen_flags: <defaults>
</compile_context>

<pallas_src>
import jax
import jax.numpy as jnp
from jax.experimental import pallas as pl
from jax.experimental.pallas import tpu as pltpu

EPS = 1e-6  # matches nn.BatchNorm1d(out_channel, eps=1e-06) in the reference module


def _round_up(v, m):
    return (v + m - 1) // m * m


def _matmul_stats_kernel(x_ref, wt_ref, y_ref, stats_ref):
    # x_ref:  (TM, Cin_p)      wt_ref: (Cin_p, Cout_p)
    # y_ref:  (TM, Cout_p) f32 stats_ref: (1, 2, Cout_p) f32  [col_sum, col_sumsq]
    y = jnp.dot(x_ref[...], wt_ref[...], preferred_element_type=jnp.float32)
    y_ref[...] = y
    col_sum = jnp.sum(y, axis=0, keepdims=True)        # (1, Cout_p)
    col_sumsq = jnp.sum(y * y, axis=0, keepdims=True)  # (1, Cout_p)
    stats = jnp.concatenate([col_sum, col_sumsq], axis=0)  # (2, Cout_p)
    stats_ref[...] = stats.reshape(stats_ref.shape)


def _normalize_kernel(y_ref, scale_ref, shift_ref, o_ref):
    # y_ref: (TM, Cout_p) f32; scale/shift: (1, Cout_p) f32; o_ref: (TM, Cout_p)
    o_ref[...] = (y_ref[...] * scale_ref[...] + shift_ref[...]).astype(o_ref.dtype)


def linear_bn(x, weight, bias, gamma, beta, *, eps=EPS, tile_m=512):
    """x: (..., C_in); weight: (C_out, C_in); bias/gamma/beta: (C_out,).

    Matches PyTorch LinearBn.forward (train-mode BN, act=None).
    """
    del bias  # exactly cancelled by train-mode BN mean subtraction (act is None)

    orig_shape = x.shape
    c_in = orig_shape[-1]
    c_out = weight.shape[0]
    m = 1
    for d in orig_shape[:-1]:
        m *= d

    # Lane-dense padding and M tiling.
    c_in_p = _round_up(c_in, 128)
    c_out_p = _round_up(c_out, 128)
    tm = min(_round_up(tile_m, 8), _round_up(m, 8))
    m_p = _round_up(m, tm)
    n_tiles = m_p // tm

    x2d = jnp.pad(x.reshape(m, c_in), ((0, m_p - m), (0, c_in_p - c_in)))
    wt = jnp.pad(weight.T, ((0, c_in_p - c_in), (0, c_out_p - c_out)))

    dt_bytes = jnp.dtype(x.dtype).itemsize
    cost1 = pl.CostEstimate(
        flops=2 * m_p * c_in_p * c_out_p,
        transcendentals=0,
        bytes_accessed=(m_p * c_in_p + c_in_p * c_out_p) * dt_bytes
        + (m_p * c_out_p + n_tiles * 2 * c_out_p) * 4,
    )

    # ---- Pass 1: tiled matmul + per-tile BN statistics partials ----
    y_pad, stats = pl.pallas_call(
        _matmul_stats_kernel,
        out_shape=(
            jax.ShapeDtypeStruct((m_p, c_out_p), jnp.float32),
            jax.ShapeDtypeStruct((n_tiles, 2, c_out_p), jnp.float32),
        ),
        grid=(n_tiles,),
        in_specs=[
            pl.BlockSpec((tm, c_in_p), lambda i: (i, 0)),
            pl.BlockSpec((c_in_p, c_out_p), lambda i: (0, 0)),
        ],
        out_specs=(
            pl.BlockSpec((tm, c_out_p), lambda i: (i, 0)),
            pl.BlockSpec((1, 2, c_out_p), lambda i: (i, 0, 0)),
        ),
        compiler_params=pltpu.CompilerParams(
            dimension_semantics=("parallel",),
            vmem_limit_bytes=32 * 1024 * 1024,
        ),
        cost_estimate=cost1,
    )(x2d, wt)

    # ---- Tiny JAX glue: combine partials, fold BN affine into scale/shift ----
    totals = jnp.sum(stats, axis=0)               # (2, c_out_p)
    mean = totals[0] / m                          # divide by REAL (unpadded) row count
    var = jnp.maximum(totals[1] / m - mean * mean, 0.0)   # biased variance
    inv_std = jax.lax.rsqrt(var + eps)
    gamma_p = jnp.pad(gamma.astype(jnp.float32), (0, c_out_p - c_out),
                      constant_values=1.0)
    beta_p = jnp.pad(beta.astype(jnp.float32), (0, c_out_p - c_out))
    scale = (gamma_p * inv_std).reshape(1, c_out_p)
    shift = (beta_p - mean * gamma_p * inv_std).reshape(1, c_out_p)

    # ---- Pass 2: apply fused scale/shift per tile ----
    out_pad = pl.pallas_call(
        _normalize_kernel,
        out_shape=jax.ShapeDtypeStruct((m_p, c_out_p), x.dtype),
        grid=(n_tiles,),
        in_specs=[
            pl.BlockSpec((tm, c_out_p), lambda i: (i, 0)),
            pl.BlockSpec((1, c_out_p), lambda i: (0, 0)),
            pl.BlockSpec((1, c_out_p), lambda i: (0, 0)),
        ],
        out_specs=pl.BlockSpec((tm, c_out_p), lambda i: (i, 0)),
        compiler_params=pltpu.CompilerParams(
            dimension_semantics=("parallel",),
            vmem_limit_bytes=32 * 1024 * 1024,
        ),
    )(y_pad, scale, shift)

    return out_pad[:m, :c_out].reshape(orig_shape[:-1] + (c_out,))


def _reference(x, weight, bias, gamma, beta):
    # Pure-JAX reference matching PyTorch LinearBn.forward in train mode
    # (bias included here -- verifies the bias-cancellation argument).
    y = jnp.einsum("...i,oi->...o", x, weight) + bias
    y2 = y.reshape(-1, y.shape[-1])
    mean = jnp.mean(y2, axis=0)
    var = jnp.mean((y2 - mean) ** 2, axis=0)
    y2 = (y2 - mean) / jnp.sqrt(var + EPS) * gamma + beta
    return y2.reshape(y.shape)


if __name__ == "__main__":
    B, N, C_IN, C_OUT = 2, 8, 32, 64

    key = jax.random.PRNGKey(0)
    k_x, k_w, k_b = jax.random.split(key, 3)

    x = jax.random.normal(k_x, (B, N, C_IN), dtype=jnp.float32)

    # PyTorch nn.Linear default init: U(-1/sqrt(in), 1/sqrt(in))
    bound = 1.0 / (C_IN ** 0.5)
    weight = jax.random.uniform(k_w, (C_OUT, C_IN), jnp.float32, -bound, bound)
    bias = jax.random.uniform(k_b, (C_OUT,), jnp.float32, -bound, bound)

    # BatchNorm1d default affine params.
    gamma = jnp.ones((C_OUT,), jnp.float32)
    beta = jnp.zeros((C_OUT,), jnp.float32)

    out = linear_bn(x, weight, bias, gamma, beta)
    out = jax.block_until_ready(out)

    ref = _reference(x, weight, bias, gamma, beta)
    assert out.shape == (B, N, C_OUT)
    assert jnp.allclose(out, ref, atol=1e-4, rtol=1e-4), "mismatch vs reference"

    print("KERNEL_OK")
</pallas_src>

<mosaic_0001>
module attributes {stable_mosaic.version = 11 : i64} {
  func.func @_matmul_stats_kernel(%arg0: i32, %arg1: memref<16x128xf32, #tpu.memory_space<vmem>>, %arg2: memref<128x128xf32, #tpu.memory_space<vmem>>, %arg3: memref<16x128xf32, #tpu.memory_space<vmem>>, %arg4: memref<1x2x128xf32, #tpu.memory_space<vmem>>) attributes {dimension_semantics = [#tpu.dimension_semantics<parallel>], iteration_bounds = array<i64: 1>, scalar_prefetch = 0 : i64, scratch_operands = 0 : i64, tpu.core_type = #tpu.core_type<tc>, window_params = [{transform_indices = @transform_0, window_bounds = array<i64: 16, 128>}, {pipeline_mode = #tpu.pipeline_mode<synchronous>, transform_indices = @transform_1, window_bounds = array<i64: 128, 128>}, {transform_indices = @transform_2, window_bounds = array<i64: 16, 128>}, {transform_indices = @transform_3, window_bounds = array<i64: 1, 2, 128>}]} {
    %c0 = arith.constant 0 : index
    %c0_0 = arith.constant 0 : index
    %0 = vector.load %arg1[%c0, %c0_0] : memref<16x128xf32, #tpu.memory_space<vmem>>, vector<16x128xf32>
    %c0_1 = arith.constant 0 : index
    %c0_2 = arith.constant 0 : index
    %1 = vector.load %arg2[%c0_1, %c0_2] : memref<128x128xf32, #tpu.memory_space<vmem>>, vector<128x128xf32>
    %cst = arith.constant dense<0.000000e+00> : vector<16x128xf32>
    %2 = tpu.matmul %0, %1, %cst {dimension_numbers = #tpu.dot_dimension_numbers<[1], [0], [0], [1], [0, 0, 1, 1], [], []>} : vector<16x128xf32>, vector<128x128xf32>, vector<16x128xf32> -> vector<16x128xf32>
    %c0_3 = arith.constant 0 : index
    %c0_4 = arith.constant 0 : index
    %3 = vector.load %arg3[%c0_3, %c0_4] : memref<16x128xf32, #tpu.memory_space<vmem>>, vector<16x128xf32>
    tpu.vector_store %arg3[%c0_3, %c0_4], %2 {strides = array<i32>} : memref<16x128xf32, #tpu.memory_space<vmem>>, vector<16x128xf32>,
    %cst_5 = arith.constant dense<0.000000e+00> : vector<128xf32>
    %4 = vector.multi_reduction <add>, %2, %cst_5 [0] : vector<16x128xf32> to vector<128xf32>
    %5 = vector.shape_cast %4 : vector<128xf32> to vector<1x128xf32>
    %6 = arith.mulf %2, %2 : vector<16x128xf32>
    %cst_6 = arith.constant dense<0.000000e+00> : vector<128xf32>
    %7 = vector.multi_reduction <add>, %6, %cst_6 [0] : vector<16x128xf32> to vector<128xf32>
    %8 = vector.shape_cast %7 : vector<128xf32> to vector<1x128xf32>
    %9 = tpu.concatenate %5, %8 in 0 : vector<1x128xf32>, vector<1x128xf32> -> vector<2x128xf32>
    %10 = vector.shape_cast %9 : vector<2x128xf32> to vector<1x2x128xf32>
    %c0_7 = arith.constant 0 : index
    %c0_8 = arith.constant 0 : index
    %c0_9 = arith.constant 0 : index
    %11 = vector.load %arg4[%c0_7, %c0_8, %c0_9] : memref<1x2x128xf32, #tpu.memory_space<vmem>>, vector<1x2x128xf32>
    tpu.vector_store %arg4[%c0_7, %c0_8, %c0_9], %10 {strides = array<i32>} : memref<1x2x128xf32, #tpu.memory_space<vmem>>, vector<1x2x128xf32>,
    return
  }
  func.func @transform_0(%arg0: i32) -> (i32, i32) {
    %c0_i32 = arith.constant 0 : i32
    %c0_i32_0 = arith.constant 0 : i32
    return %arg0, %c0_i32 : i32, i32
  }
  func.func @transform_1(%arg0: i32) -> (i32, i32) {
    %c0_i32 = arith.constant 0 : i32
    %c0_i32_0 = arith.constant 0 : i32
    %c0_i32_1 = arith.constant 0 : i32
    return %c0_i32, %c0_i32_0 : i32, i32
  }
  func.func @transform_2(%arg0: i32) -> (i32, i32) {
    %c0_i32 = arith.constant 0 : i32
    %c0_i32_0 = arith.constant 0 : i32
    return %arg0, %c0_i32 : i32, i32
  }
  func.func @transform_3(%arg0: i32) -> (i32, i32, i32) {
    %c0_i32 = arith.constant 0 : i32
    %c0_i32_0 = arith.constant 0 : i32
    %c0_i32_1 = arith.constant 0 : i32
    return %arg0, %c0_i32, %c0_i32_0 : i32, i32, i32
  }
}

</mosaic_0001>

<bundles_post_ra>
// kernel: tpu_custom_call.1
= control target key start
LH: loop header
LB: loop body
LE: loop exit
PB: predicated region body
PF: predicated region fallthrough
CT: control target
= control target key end

     0   :  { %9 = vsyncpa [#allocation3], 0  ;;  %s383_s0 = inlined_call_operand.hbm [shape: f32[16,128], index: 0, kind: input, shape index: {}]   ;;  %s384_s1 = inlined_call_operand.hbm [shape: f32[128,128], index: 1, kind: input, shape index: {}]   ;;  %s385_s2 = inlined_call_operand.hbm [shape: f32[16,128], index: 2, kind: output, shape index: {0}]   ;;  %s386_s3 = inlined_call_operand.hbm [shape: f32[1,2,128], index: 3, kind: output, shape index: {1}]  }
   0x1   :  { %10 = vsyncpa [#allocation6], 0 }
   0x2   :  { %11 = vsyncpa [#allocation4], 0 }
   0x3   :  { %12 = vsyncpa [#allocation9], 0  ;;  %s336_s12 = smov [#allocation2]  }
   0x4   :  { %s18_s13 = sshll.u32 %s336_s12, 4  ;;  %s19_s13 = int_to_ptr.vmem [resolvable:$true] %s18_s13 }
   0x5   :  { %s256_s14 = scalar_lea.vmem %s19_s13, 256  ;;  %p261_p1 = scmp.lt.s32.totalorder %s19_s13, %s19_s13 }
   0x6   :  { %p257_p0 = scmp.ne.s32.totalorder %s19_s13, %s256_s14  ;;  %p262_p2 = scmp.lt.s32.totalorder %s256_s14, %s256_s14 }
   0x8   :  { %p263_p3 = por %p262_p2, %p261_p1 }
   0xa   :  { %p264_p4 = pnand %p263_p3, %p257_p0 }
   0xc   :  { %267 = shalt.err (!%p264_p4)
}
   0xd   :  { %s337_s15 = smov 128   ;;  %s338_s16 = smov 8  }
   0xe   :  { %24 = dma.hbm_to_vmem [thread:$0]  %s383_s0, 256, %s19_s13, [#allocation3], %s337_s15, %s337_s15, %s338_s16  }
   0xf   :  { %s339_s19 = smov [#allocation5]  }
  0x10   :  { %s30_s20 = sshll.u32 %s339_s19, 4  ;;  %s31_s20 = int_to_ptr.vmem [resolvable:$true] %s30_s20 }
  0x11   :  { %s276_s21 = scalar_lea.vmem %s31_s20, 2048  ;;  %p281_p6 = scmp.lt.s32.totalorder %s31_s20, %s31_s20 }
  0x12   :  { %p277_p5 = scmp.ne.s32.totalorder %s31_s20, %s276_s21  ;;  %p282_p7 = scmp.lt.s32.totalorder %s276_s21, %s276_s21 }
  0x14   :  { %p283_p8 = por %p282_p7, %p281_p6 }
  0x16   :  { %p284_p9 = pnand %p283_p8, %p277_p5 }
  0x18   :  { %287 = shalt.err (!%p284_p9)
}
  0x19   :  { %36 = dma.hbm_to_vmem [thread:$0]  %s384_s1, 2048, %s31_s20, [#allocation6], %s337_s15, %s337_s15, %s338_s16  }
  0x1a   :  { %328 = dma.done.wait [#allocation3], 256  }
  0x1b   :  { %329 = vsyncadd [#allocation3], 4294967040 }
  0x1c   :  { %330 = dma.done.wait [#allocation6], 2048  }
  0x1d   :  { %331 = vsyncadd [#allocation6], 4294965248  ;;  %v60_v0 = vld [vmem:[#allocation5 + $0x78] sm:$0xff]  ;;  %v59_v1 = vld [vmem:[#allocation5 + $0x70] sm:$0xff]  ;;  %s340_s0 = smov [#allocation7]  }
  0x1e   :  { %207 = vmatprep.subr.mxu0 %v60_v0  ;;  %v58_v2 = vld [vmem:[#allocation5 + $0x68] sm:$0xff]  ;;  %v57_v3 = vld [vmem:[#allocation5 + $0x60] sm:$0xff]  ;;  %v43_v4 = vld [vmem:[#allocation2] sm:$0xff]  ;;  %s162_s1 = sshll.u32 %s340_s0, 4  ;;  %s163_s1 = int_to_ptr.vmem [resolvable:$true] %s162_s1 }
  0x1f   :  { %208 = vmatpush3.msra.mxu0 %v60_v0  ;;  %v56_v5 = vld [vmem:[#allocation5 + $0x58] sm:$0xff]  ;;  %239 = vmatprep.mubr.f32.mxu0 %v43_v4  ;;  %v55_v6 = vld [vmem:[#allocation5 + $0x50] sm:$0xff]  ;;  %v54_v7 = vld [vmem:[#allocation5 + $0x48] sm:$0xff]  ;;  %s288_s24 = scalar_lea.vmem %s163_s1, 256  ;;  %p293_p11 = scmp.lt.s32.totalorder %s163_s1, %s163_s1 }
  0x20   :  { %209 = vmatprep.subr.mxu0 %v59_v1  ;;  %v53_v8 = vld [vmem:[#allocation5 + $0x40] sm:$0xff]  ;;  %v52_v9 = vld [vmem:[#allocation5 + $0x38] sm:$0xff]  ;;  %v51_v10 = vld [vmem:[#allocation5 + $0x30] sm:$0xff]  ;;  %p289_p10 = scmp.ne.s32.totalorder %s163_s1, %s288_s24  ;;  %p294_p12 = scmp.lt.s32.totalorder %s288_s24, %s288_s24 }
  0x21   :  { %210 = vmatpush3.msra.mxu0 %v59_v1  ;;  %v50_v11 = vld [vmem:[#allocation5 + $0x28] sm:$0xff]  ;;  %v49_v12 = vld [vmem:[#allocation5 + $0x20] sm:$0xff]  ;;  %v48_v13 = vld [vmem:[#allocation5 + $0x18] sm:$0xff] }
  0x22   :  { %211 = vmatprep.subr.mxu0 %v58_v2  ;;  %v47_v14 = vld [vmem:[#allocation5 + $0x10] sm:$0xff]  ;;  %v46_v15 = vld [vmem:[#allocation5 + $0x8] sm:$0xff]  ;;  %v45_v16 = vld [vmem:[#allocation5] sm:$0xff]  ;;  %p295_p13 = por %p294_p12, %p293_p11 }
  0x23   :  { %212 = vmatpush3.msra.mxu0 %v58_v2  ;;  %v44_v17 = vld [vmem:[#allocation2 + $0x8] sm:$0xff] }
  0x24   :  { %213 = vmatprep.subr.mxu0 %v57_v3  ;;  %p296_p0 = pnand %p295_p13, %p289_p10 }
  0x25   :  { %214 = vmatpush3.msra.mxu0 %v57_v3 }
  0x26   :  { %215 = vmatprep.subr.mxu0 %v56_v5 }
  0x27   :  { %216 = vmatpush3.msra.mxu0 %v56_v5 }
  0x28   :  { %217 = vmatprep.subr.mxu0 %v55_v6 }
  0x29   :  { %218 = vmatpush3.msra.mxu0 %v55_v6 }
  0x2a   :  { %219 = vmatprep.subr.mxu0 %v54_v7 }
  0x2b   :  { %220 = vmatpush3.msra.mxu0 %v54_v7 }
  0x2c   :  { %221 = vmatprep.subr.mxu0 %v53_v8 }
  0x2d   :  { %222 = vmatpush3.msra.mxu0 %v53_v8 }
  0x2e   :  { %223 = vmatprep.subr.mxu0 %v52_v9 }
  0x2f   :  { %224 = vmatpush3.msra.mxu0 %v52_v9 }
  0x30   :  { %225 = vmatprep.subr.mxu0 %v51_v10 }
  0x31   :  { %226 = vmatpush3.msra.mxu0 %v51_v10 }
  0x32   :  { %227 = vmatprep.subr.mxu0 %v50_v11 }
  0x33   :  { %228 = vmatpush3.msra.mxu0 %v50_v11 }
  0x34   :  { %229 = vmatprep.subr.mxu0 %v49_v12 }
  0x35   :  { %230 = vmatpush3.msra.mxu0 %v49_v12 }
  0x36   :  { %231 = vmatprep.subr.mxu0 %v48_v13 }
  0x37   :  { %232 = vmatpush3.msra.mxu0 %v48_v13 }
  0x38   :  { %233 = vmatprep.subr.mxu0 %v47_v14 }
  0x39   :  { %234 = vmatpush3.msra.mxu0 %v47_v14 }
  0x3a   :  { %235 = vmatprep.subr.mxu0 %v46_v15 }
  0x3b   :  { %236 = vmatpush3.msra.mxu0 %v46_v15 }
  0x3c   :  { %237 = vmatprep.subr.mxu0 %v45_v16 }
  0x3d   :  { %238 = vmatpush3.msra.mxu0 %v45_v16 }
  0x3e   :  { %240 = vmatmul.mubr.f32.vlgmr.msra.gmra.mxu0 %v44_v17 }
  0xfe   :  { %v241_v18 = vpop.f32.mrf.mxu0 }
  0xff   :  { %137 = vst [vmem:[#allocation7 + $0x8] sm:$0xff] %v241_v18  ;;  %v146_v20 = vmul.f32 %v241_v18, %v241_v18 }
 0x100   :  { %v127_v19 = vpop.f32.mrf.mxu0 }
 0x101   :  { %136 = vst [vmem:[#allocation7] sm:$0xff] %v127_v19  ;;  %v138_v21 = vadd.f32 %v241_v18, %v127_v19  ;;  %v145_v22 = vmul.f32 %v127_v19, %v127_v19 }
 0x102   :  { %299 = shalt.err (!%p296_p0)
}
 0x103   :  { %168 = dma.vmem_to_hbm [thread:$0]  %s163_s1, 256, %s385_s2, [#allocation4], %s337_s15, %s337_s15, %s338_s16   ;;  %v139_v23 = vrot.slane %v138_v21, 4  ;;  %v147_v24 = vadd.f32 %v146_v20, %v145_v22  ;;  %vm154_vm0 = vcmask 1040384  }
 0x104   :  { %s341_s27 = smov [#allocation8]  }
 0x105   :  { %v140_v25 = vadd.f32 %v139_v23, %v138_v21  ;;  %v148_v26 = vrot.slane %v147_v24, 4  ;;  %s175_s28 = sshll.u32 %s341_s27, 4  ;;  %s176_s28 = int_to_ptr.vmem [resolvable:$true] %s175_s28 }
 0x106   :  { %s308_s2 = scalar_lea.vmem %s176_s28, 32  ;;  %p313_p2 = scmp.lt.s32.totalorder %s176_s28, %s176_s28 }
 0x107   :  { %v141_v27 = vrot.slane %v140_v25, 2  ;;  %v149_v28 = vadd.f32 %v148_v26, %v147_v24  ;;  %p309_p1 = scmp.ne.s32.totalorder %s176_s28, %s308_s2  ;;  %p314_p3 = scmp.lt.s32.totalorder %s308_s2, %s308_s2 }
 0x109   :  { %v142_v29 = vadd.f32 %v141_v27, %v140_v25  ;;  %v150_v30 = vrot.slane %v149_v28, 2  ;;  %p315_p4 = por %p314_p3, %p313_p2 }
 0x10b   :  { %v143_v31 = vrot.slane %v142_v29, 1  ;;  %v151_v32 = vadd.f32 %v150_v30, %v149_v28  ;;  %p316_p5 = pnand %p315_p4, %p309_p1 }
 0x10d   :  { %v152_v33 = vrot.slane %v151_v32, 1  ;;  %v144_v34 = vadd.f32 %v143_v31, %v142_v29 }
 0x10f   :  { %v153_v35 = vadd.f32 %v152_v33, %v151_v32 }
 0x111   :  { %v155_v36 = vsel %vm154_vm0, %v144_v34, %v153_v35 }
 0x112   :  { %156 = vst [vmem:[#allocation8] sm:$0x3] %v155_v36 }
 0x113   :  { %319 = shalt.err (!%p316_p5)
}
 0x114   :  { %178 = dma.vmem_to_hbm [thread:$0]  %s176_s28, 32, %s386_s3, [#allocation9]  }
 0x115   :  { %332 = dma.done.wait [#allocation4], 256  }
 0x116   :  { %333 = vsyncadd [#allocation4], 4294967040 }
 0x117   :  { %334 = dma.done.wait [#allocation9], 32  }
 0x118   :  { %335 = vsyncadd [#allocation9], 4294967264 }
 0x119   :  { %185 = vsyncpa [#allocation3], 1 }
 0x11a   :  { %186 = vsyncpa [#allocation6], 1 }
 0x11b   :  { %187 = vsyncpa [#allocation4], 1 }
 0x11c   :  { %188 = vsyncpa [#allocation9], 1 }

</bundles_post_ra>
